<compile_context>
chip_gen: v5e
topology: v5e:2x2
jax: 0.10.0
libtpu: 0.0.40
codegen_flags: <defaults>
</compile_context>

<pallas_src>
import functools

import jax
import jax.numpy as jnp
import numpy as np
from jax import lax
from jax.experimental import pallas as pl
from jax.experimental.pallas import tpu as pltpu


def layernorm_channel_kernel(x_ref, w_ref, b_ref, o_ref, *, eps, inv_c):
    # x_ref / o_ref: (Bt, C, T) VMEM tiles; w_ref / b_ref: (C, 1), resident.
    x = x_ref[...].astype(jnp.float32)                    # (Bt, C, T)
    s1 = jnp.sum(x, axis=-2, keepdims=True)               # (Bt, 1, T) sublane reduce
    s2 = jnp.sum(x * x, axis=-2, keepdims=True)           # (Bt, 1, T)
    u = s1 * inv_c                                        # mean over C
    var = jnp.maximum(s2 * inv_c - u * u, 0.0)            # biased variance, clamped
    inv = lax.rsqrt(var + eps)                            # EUP
    w = w_ref[...].astype(jnp.float32)                    # (C, 1) -> broadcasts over lanes
    b = b_ref[...].astype(jnp.float32)                    # (C, 1)
    o_ref[...] = (w * ((x - u) * inv) + b).astype(o_ref.dtype)


def _choose_tiles(B, C, HW, itemsize, max_block_bytes):
    """Pick (Bt, T, grid_j) so Bt*C*T*itemsize ~<= max_block_bytes."""
    plane_bytes = C * HW * itemsize
    if HW % 128 == 0:
        # Largest multiple of 128 that divides HW and fits the cap (min 128).
        cands = [t for t in range(128, HW + 1, 128) if HW % t == 0]
        fits = [t for t in cands if C * t * itemsize <= max_block_bytes]
        T = max(fits) if fits else min(cands)
        grid_j = HW // T
    elif plane_bytes <= max_block_bytes or HW <= 128:
        # Full spatial plane per step (block dim == array dim: always legal).
        T = HW
        grid_j = 1
    else:
        # Split HW with a 128-multiple tile; tail block is masked by Pallas
        # (garbage lanes are computed but never written back).
        T = max(128, (max_block_bytes // (C * itemsize * 128)) * 128)
        T = min(T, (HW // 128) * 128)
        grid_j = pl.cdiv(HW, T)

    # Batch tile: as many planes as fit under the cap (must divide B).
    plane = C * T * itemsize
    fits_b = [b for b in range(1, B + 1) if B % b == 0 and b * plane <= max_block_bytes]
    Bt = max(fits_b) if fits_b else 1
    return Bt, T, grid_j


def layernorm_channel_forward(x, weight, bias, eps=1e-5, max_block_bytes=2 << 20):
    """x: (B, C, H, W); weight, bias: (C,). Returns LayerNormChannel(x)."""
    B, C, H, W = x.shape
    HW = H * W
    xf = x.reshape(B, C, HW)
    itemsize = jnp.dtype(x.dtype).itemsize

    Bt, T, grid_j = _choose_tiles(B, C, HW, itemsize, max_block_bytes)
    grid = (B // Bt, grid_j)

    # Explicit, generation-aware scoped-VMEM budget:
    #   2x in + 2x out pipeline buffers + ~3x block of f32 temporaries.
    block_bytes = Bt * C * T * itemsize
    f32_tmp = 3 * Bt * C * T * 4
    need = 4 * block_bytes + f32_tmp + 2 * C * 128 * 4
    vmem_limit = int(min(max(2 * need, 32 << 20), 48 << 20))  # <=48 MiB: safe on v7x too

    kernel = functools.partial(
        layernorm_channel_kernel, eps=float(eps), inv_c=1.0 / float(C))

    out = pl.pallas_call(
        kernel,
        out_shape=jax.ShapeDtypeStruct((B, C, HW), x.dtype),
        grid=grid,
        in_specs=[
            pl.BlockSpec((Bt, C, T), lambda b, j: (b, 0, j)),
            pl.BlockSpec((C, 1), lambda b, j: (0, 0)),   # weight: resident
            pl.BlockSpec((C, 1), lambda b, j: (0, 0)),   # bias:   resident
        ],
        out_specs=pl.BlockSpec((Bt, C, T), lambda b, j: (b, 0, j)),
        compiler_params=pltpu.CompilerParams(
            dimension_semantics=("parallel", "parallel"),
            vmem_limit_bytes=vmem_limit),
    )(xf, weight.reshape(C, 1), bias.reshape(C, 1))
    return out.reshape(B, C, H, W)


def ref_layernorm_channel(x_np, w_np, b_np, eps=1e-5):
    """NumPy (float64) reference matching PyTorch LayerNormChannel.forward."""
    x64 = x_np.astype(np.float64)
    u = x64.mean(axis=1, keepdims=True)
    s = ((x64 - u) ** 2).mean(axis=1, keepdims=True)
    y = (x64 - u) / np.sqrt(s + eps)
    out = w_np.astype(np.float64)[None, :, None, None] * y \
        + b_np.astype(np.float64)[None, :, None, None]
    return out.astype(x_np.dtype)


def _check(B, C, H, W, key, eps=1e-5):
    kx, kw, kb = jax.random.split(key, 3)
    x = jax.random.normal(kx, (B, C, H, W), dtype=jnp.float32)
    weight = jax.random.normal(kw, (C,), dtype=jnp.float32)
    bias = jax.random.normal(kb, (C,), dtype=jnp.float32)

    out = layernorm_channel_forward(x, weight, bias, eps=eps)
    out = jax.block_until_ready(out)

    ref = ref_layernorm_channel(np.asarray(x), np.asarray(weight),
                                np.asarray(bias), eps=eps)
    np.testing.assert_allclose(np.asarray(out), ref, rtol=1e-4, atol=1e-4)


if __name__ == "__main__":
    key = jax.random.PRNGKey(0)
    k0, k1 = jax.random.split(key, 2)

    # 128-aligned spatial path (HW = 256), batched planes per step.
    _check(2, 4, 16, 16, k0)
    # Non-128-aligned fallback path (HW = 49), like PoolFormer's 7x7 stage.
    _check(3, 8, 7, 7, k1)

    print("KERNEL_OK")
</pallas_src>

<mosaic_0001>
module attributes {stable_mosaic.version = 11 : i64} {
  func.func @layernorm_channel_kernel(%arg0: i32, %arg1: i32, %arg2: memref<2x4x256xf32, #tpu.memory_space<vmem>>, %arg3: memref<4x1xf32, #tpu.memory_space<vmem>>, %arg4: memref<4x1xf32, #tpu.memory_space<vmem>>, %arg5: memref<2x4x256xf32, #tpu.memory_space<vmem>>) attributes {dimension_semantics = [#tpu.dimension_semantics<parallel>, #tpu.dimension_semantics<parallel>], iteration_bounds = array<i64: 1, 1>, scalar_prefetch = 0 : i64, scratch_operands = 0 : i64, tpu.core_type = #tpu.core_type<tc>, window_params = [{transform_indices = @transform_0, window_bounds = array<i64: 2, 4, 256>}, {pipeline_mode = #tpu.pipeline_mode<synchronous>, transform_indices = @transform_1, window_bounds = array<i64: 4, 1>}, {pipeline_mode = #tpu.pipeline_mode<synchronous>, transform_indices = @transform_2, window_bounds = array<i64: 4, 1>}, {transform_indices = @transform_3, window_bounds = array<i64: 2, 4, 256>}]} {
    %c0 = arith.constant 0 : index
    %c0_0 = arith.constant 0 : index
    %c0_1 = arith.constant 0 : index
    %0 = vector.load %arg2[%c0, %c0_0, %c0_1] : memref<2x4x256xf32, #tpu.memory_space<vmem>>, vector<2x4x256xf32>
    %cst = arith.constant dense<0.000000e+00> : vector<2x256xf32>
    %1 = vector.multi_reduction <add>, %0, %cst [1] : vector<2x4x256xf32> to vector<2x256xf32>
    %2 = vector.shape_cast %1 : vector<2x256xf32> to vector<2x1x256xf32>
    %3 = arith.mulf %0, %0 : vector<2x4x256xf32>
    %cst_2 = arith.constant dense<0.000000e+00> : vector<2x256xf32>
    %4 = vector.multi_reduction <add>, %3, %cst_2 [1] : vector<2x4x256xf32> to vector<2x256xf32>
    %5 = vector.shape_cast %4 : vector<2x256xf32> to vector<2x1x256xf32>
    %cst_3 = arith.constant 2.500000e-01 : f32
    %6 = vector.broadcast %cst_3 : f32 to vector<2x1x256xf32>
    %7 = arith.mulf %2, %6 : vector<2x1x256xf32>
    %cst_4 = arith.constant 2.500000e-01 : f32
    %8 = vector.broadcast %cst_4 : f32 to vector<2x1x256xf32>
    %9 = arith.mulf %5, %8 : vector<2x1x256xf32>
    %10 = arith.mulf %7, %7 : vector<2x1x256xf32>
    %11 = arith.subf %9, %10 : vector<2x1x256xf32>
    %cst_5 = arith.constant 0.000000e+00 : f32
    %12 = vector.broadcast %cst_5 : f32 to vector<2x1x256xf32>
    %13 = arith.maximumf %11, %12 : vector<2x1x256xf32>
    %cst_6 = arith.constant 9.99999974E-6 : f32
    %14 = vector.broadcast %cst_6 : f32 to vector<2x1x256xf32>
    %15 = arith.addf %13, %14 : vector<2x1x256xf32>
    %16 = math.rsqrt %15 : vector<2x1x256xf32>
    %c0_7 = arith.constant 0 : index
    %c0_8 = arith.constant 0 : index
    %17 = vector.load %arg3[%c0_7, %c0_8] : memref<4x1xf32, #tpu.memory_space<vmem>>, vector<4x1xf32>
    %c0_9 = arith.constant 0 : index
    %c0_10 = arith.constant 0 : index
    %18 = vector.load %arg4[%c0_9, %c0_10] : memref<4x1xf32, #tpu.memory_space<vmem>>, vector<4x1xf32>
    %19 = vector.broadcast %7 : vector<2x1x256xf32> to vector<2x4x256xf32>
    %20 = arith.subf %0, %19 : vector<2x4x256xf32>
    %21 = vector.broadcast %16 : vector<2x1x256xf32> to vector<2x4x256xf32>
    %22 = arith.mulf %20, %21 : vector<2x4x256xf32>
    %23 = vector.shape_cast %17 : vector<4x1xf32> to vector<1x4x1xf32>
    %24 = vector.broadcast %23 : vector<1x4x1xf32> to vector<2x4x256xf32>
    %25 = arith.mulf %24, %22 : vector<2x4x256xf32>
    %26 = vector.shape_cast %18 : vector<4x1xf32> to vector<1x4x1xf32>
    %27 = vector.broadcast %26 : vector<1x4x1xf32> to vector<2x4x256xf32>
    %28 = arith.addf %25, %27 : vector<2x4x256xf32>
    %c0_11 = arith.constant 0 : index
    %c0_12 = arith.constant 0 : index
    %c0_13 = arith.constant 0 : index
    %29 = vector.load %arg5[%c0_11, %c0_12, %c0_13] : memref<2x4x256xf32, #tpu.memory_space<vmem>>, vector<2x4x256xf32>
    tpu.vector_store %arg5[%c0_11, %c0_12, %c0_13], %28 {strides = array<i32>} : memref<2x4x256xf32, #tpu.memory_space<vmem>>, vector<2x4x256xf32>,
    return
  }
  func.func @transform_0(%arg0: i32, %arg1: i32) -> (i32, i32, i32) {
    %c0_i32 = arith.constant 0 : i32
    %c0_i32_0 = arith.constant 0 : i32
    return %arg0, %c0_i32, %arg1 : i32, i32, i32
  }
  func.func @transform_1(%arg0: i32, %arg1: i32) -> (i32, i32) {
    %c0_i32 = arith.constant 0 : i32
    %c0_i32_0 = arith.constant 0 : i32
    %c0_i32_1 = arith.constant 0 : i32
    return %c0_i32, %c0_i32_0 : i32, i32
  }
  func.func @transform_2(%arg0: i32, %arg1: i32) -> (i32, i32) {
    %c0_i32 = arith.constant 0 : i32
    %c0_i32_0 = arith.constant 0 : i32
    %c0_i32_1 = arith.constant 0 : i32
    return %c0_i32, %c0_i32_0 : i32, i32
  }
  func.func @transform_3(%arg0: i32, %arg1: i32) -> (i32, i32, i32) {
    %c0_i32 = arith.constant 0 : i32
    %c0_i32_0 = arith.constant 0 : i32
    return %arg0, %c0_i32, %arg1 : i32, i32, i32
  }
}

</mosaic_0001>

<bundles_post_ra>
// kernel: tpu_custom_call.1
= control target key start
LH: loop header
LB: loop body
LE: loop exit
PB: predicated region body
PF: predicated region fallthrough
CT: control target
= control target key end

     0   :  { %8 = vsyncpa [#allocation3], 0  ;;  %s440_s0 = inlined_call_operand.hbm [shape: f32[2,4,256], index: 0, kind: input, shape index: {}]   ;;  %s441_s1 = inlined_call_operand.vmem [shape: f32[4,1], index: 1, kind: input, shape index: {}]   ;;  %s442_s2 = inlined_call_operand.vmem [shape: f32[4,1], index: 2, kind: input, shape index: {}]   ;;  %s443_s3 = inlined_call_operand.hbm [shape: f32[2,4,256], index: 3, kind: output, shape index: {}]  }
   0x1   :  { %9 = vsyncpa [#allocation4], 0  ;;  %s14_s14 = sshll.u32 %s440_s0, 4  ;;  %s336_s15 = smov [#allocation2]   ;;  %s15_s14 = int_to_ptr.hbm [resolvable:$true] %s14_s14 }
   0x2   :  { %s16_s16 = sshll.u32 %s336_s15, 4  ;;  %s337_s17 = smov 128   ;;  %s17_s16 = int_to_ptr.vmem [resolvable:$true] %s16_s16 }
   0x3   :  { %s338_s18 = smov 8  }
   0x4   :  { %22 = dma.hbm_to_vmem [thread:$0]  %s15_s14, 256, %s17_s16, [#allocation3], %s337_s17, %s337_s17, %s338_s18  }
   0x5   :  { %332 = dma.done.wait [#allocation3], 256  }
   0x6   :  { %333 = vsyncadd [#allocation3], 4294967040  ;;  %v339_v0 = vmov 0   ;;  %v182_v1 = vld [vmem:[%s441_s1] sm:$0xf]  ;;  %v373_v3 = vld [vmem:[#allocation2] sm:$0xff] }
   0x7   :  { %275 = vset.pattern.permute.xlu0 %v339_v0  ;;  %v183_v2 = vld [vmem:[%s442_s2] sm:$0xf]  ;;  %v375_v4 = vld [vmem:[#allocation2 + $0x8] sm:$0xff]  ;;  %35 = vst [vmem:[#allocation1] ss:$2 sm:$0xff] %v373_v3  ;;  %v75_v5 = vmul.f32 %v373_v3, %v373_v3  ;;  %vm46_vm0 = vcmask 1043456  }
   0x8   :  { %210 = vperm.xlu0 %275, %v182_v1   ;;  %39 = vst [vmem:[#allocation1 + $0x10] ss:$2 sm:$0xff] %v375_v4  ;;  %v76_v6 = vmul.f32 %v375_v4, %v375_v4  ;;  %s340_s1 = smov [#allocation5]   ;;  %s257_s24 = sshll.u32 %s443_s3, 4  ;;  %s258_s24 = int_to_ptr.hbm [resolvable:$true] %s257_s24 }
   0x9   :  { %s255_s2 = sshll.u32 %s340_s1, 4  ;;  %s256_s2 = int_to_ptr.vmem [resolvable:$true] %s255_s2 }
   0xe   :  { %v36_v7 = vld.sshfl [vmem:[#allocation1] sm:$0xff pattern:$0x75316420]  ;;  %v37_v8 = vld.sshfl [vmem:[#allocation1 + $0x8] sm:$0xff pattern:$0x75316420] }
   0xf   :  { %v40_v9 = vld.sshfl [vmem:[#allocation1 + $0x10] sm:$0xff pattern:$0x75316420]  ;;  %v41_v10 = vld.sshfl [vmem:[#allocation1 + $0x18] sm:$0xff pattern:$0x75316420] }
  0x10   :  { %232 = vperm.xlu0 %275, %v183_v2   ;;  %79 = vst [vmem:[#allocation1] ss:$2 sm:$0xff] %v75_v5  ;;  %v54_v11 = vsel %vm46_vm0, %v37_v8, 0.0  ;;  %v68_v12 = vsel %vm46_vm0, %v41_v10, 0.0  ;;  %v47_v15 = vsel %vm46_vm0, %v36_v7, 0.0  ;;  %v61_v16 = vsel %vm46_vm0, %v40_v9, 0.0 }
  0x11   :  { %83 = vst [vmem:[#allocation1 + $0x10] ss:$2 sm:$0xff] %v76_v6  ;;  %v55_v13 = vrot.slane %v54_v11, 4  ;;  %v69_v14 = vrot.slane %v68_v12, 4  ;;  %v48_v18 = vrot.slane %v47_v15, 4  ;;  %v62_v20 = vrot.slane %v61_v16, 4 }
  0x13   :  { %v56_v19 = vadd.f32 %v55_v13, %v54_v11  ;;  %v70_v21 = vadd.f32 %v69_v14, %v68_v12  ;;  %v49_v25 = vadd.f32 %v48_v18, %v47_v15  ;;  %v63_v27 = vadd.f32 %v62_v20, %v61_v16 }
  0x15   :  { %v57_v26 = vrot.slane %v56_v19, 2  ;;  %v71_v28 = vrot.slane %v70_v21, 2  ;;  %v50_v33 = vrot.slane %v49_v25, 2  ;;  %v64_v35 = vrot.slane %v63_v27, 2 }
  0x17   :  { %v81_v17 = vld.sshfl [vmem:[#allocation1 + $0x8] sm:$0xff pattern:$0x75316420]  ;;  %v80_v22 = vld.sshfl [vmem:[#allocation1] sm:$0xff pattern:$0x75316420]  ;;  %v58_v34 = vadd.f32 %v57_v26, %v56_v19  ;;  %v72_v36 = vadd.f32 %v71_v28, %v70_v21  ;;  %v51_v41 = vadd.f32 %v50_v33, %v49_v25  ;;  %v65_v43 = vadd.f32 %v64_v35, %v63_v27 }
  0x18   :  { %v84_v23 = vld.sshfl [vmem:[#allocation1 + $0x10] sm:$0xff pattern:$0x75316420]  ;;  %v85_v24 = vld.sshfl [vmem:[#allocation1 + $0x18] sm:$0xff pattern:$0x75316420] }
  0x19   :  { %v90_v29 = vsel %vm46_vm0, %v80_v22, 0.0  ;;  %v97_v30 = vsel %vm46_vm0, %v81_v17, 0.0  ;;  %v104_v31 = vsel %vm46_vm0, %v84_v23, 0.0  ;;  %v111_v32 = vsel %vm46_vm0, %v85_v24, 0.0 }
  0x1a   :  { %v91_v37 = vrot.slane %v90_v29, 4  ;;  %v98_v38 = vrot.slane %v97_v30, 4  ;;  %v105_v39 = vrot.slane %v104_v31, 4  ;;  %v112_v40 = vrot.slane %v111_v32, 4 }
  0x1b   :  { %v59_v42 = vrot.slane %v58_v34, 1  ;;  %v73_v44 = vrot.slane %v72_v36, 1  ;;  %v52_v49 = vrot.slane %v51_v41, 1  ;;  %v66_v51 = vrot.slane %v65_v43, 1 }
  0x1c   :  { %v92_v45 = vadd.f32 %v91_v37, %v90_v29  ;;  %v99_v46 = vadd.f32 %v98_v38, %v97_v30  ;;  %v106_v47 = vadd.f32 %v105_v39, %v104_v31  ;;  %v113_v48 = vadd.f32 %v112_v40, %v111_v32 }
  0x1d   :  { %v60_v50 = vadd.f32 %v59_v42, %v58_v34  ;;  %v74_v52 = vadd.f32 %v73_v44, %v72_v36  ;;  %v53_v57 = vadd.f32 %v52_v49, %v51_v41  ;;  %v67_v58 = vadd.f32 %v66_v51, %v65_v43 }
  0x1e   :  { %v93_v53 = vrot.slane %v92_v45, 2  ;;  %v100_v54 = vrot.slane %v99_v46, 2  ;;  %v107_v55 = vrot.slane %v106_v47, 2  ;;  %v114_v56 = vrot.slane %v113_v48, 2 }
  0x1f   :  { %v391_v59 = vmul.f32 0.25, %v60_v50  ;;  %v393_v60 = vmul.f32 0.25, %v74_v52  ;;  %v395_v1 = vmul.f32 0.25, %v53_v57  ;;  %v397_v2 = vmul.f32 0.25, %v67_v58 }
  0x20   :  { %v94_v61 = vadd.f32 %v93_v53, %v92_v45  ;;  %v101_v62 = vadd.f32 %v100_v54, %v99_v46  ;;  %v108_v63 = vadd.f32 %v107_v55, %v106_v47  ;;  %v115_v0 = vadd.f32 %v114_v56, %v113_v48 }
  0x21   :  { %v126_v9 = vmul.f32 %v395_v1, %v395_v1  ;;  %v127_v10 = vmul.f32 %v391_v59, %v391_v59  ;;  %v128_v11 = vmul.f32 %v397_v2, %v397_v2  ;;  %v129_v12 = vmul.f32 %v393_v60, %v393_v60 }
  0x22   :  { %v95_v5 = vrot.slane %v94_v61, 1  ;;  %v102_v6 = vrot.slane %v101_v62, 1  ;;  %v109_v7 = vrot.slane %v108_v63, 1  ;;  %v116_v8 = vrot.slane %v115_v0, 1 }
  0x23   :  { %v188_v51 = vrot.slane %v391_v59, 4  ;;  %v189_v52 = vrot.slane %v393_v60, 4 }
  0x24   :  { %v96_v13 = vadd.f32 %v95_v5, %v94_v61  ;;  %v103_v14 = vadd.f32 %v102_v6, %v101_v62  ;;  %v110_v15 = vadd.f32 %v109_v7, %v108_v63  ;;  %v117_v16 = vadd.f32 %v116_v8, %v115_v0 }
  0x25   :  { %v190_v58 = vsel %vm46_vm0, %v395_v1, %v188_v51  ;;  %v191_v63 = vsel %vm46_vm0, %v397_v2, %v189_v52 }
  0x26   :  { %v122_v17 = vmul.f32 0.25, %v96_v13  ;;  %v123_v18 = vmul.f32 0.25, %v103_v14  ;;  %v124_v19 = vmul.f32 0.25, %v110_v15  ;;  %v125_v20 = vmul.f32 0.25, %v117_v16 }
  0x27   :  { %v194_v0 = vsub.f32 %v373_v3, %v190_v58  ;;  %v195_v8 = vsub.f32 %v375_v4, %v191_v63 }
  0x28   :  { %v130_v21 = vsub.f32 %v122_v17, %v126_v9  ;;  %v131_v22 = vsub.f32 %v123_v18, %v127_v10  ;;  %v132_v23 = vsub.f32 %v124_v19, %v128_v11  ;;  %v133_v24 = vsub.f32 %v125_v20, %v129_v12 }
  0x2a   :  { %v134_v25 = vmax.f32 %v130_v21, 0.0  ;;  %v135_v26 = vmax.f32 %v131_v22, 0.0  ;;  %v136_v27 = vmax.f32 %v132_v23, 0.0  ;;  %v137_v28 = vmax.f32 %v133_v24, 0.0 }
  0x2c   :  { %v138_v29 = vadd.f32 1e-05, %v134_v25  ;;  %v139_v30 = vadd.f32 1e-05, %v135_v26  ;;  %v140_v31 = vadd.f32 1e-05, %v136_v27 }
  0x2d   :  { %v141_v32 = vadd.f32 1e-05, %v137_v28 }
  0x2e   :  { %276 = vrsqrt.f32 %v138_v29  ;;  %vm158_vm1 = vweird.f32 %v139_v30  ;;  %vm148_vm3 = vweird.f32 %v138_v29  ;;  %vm168_vm8 = vweird.f32 %v140_v31 }
  0x2f   :  { %278 = vrsqrt.f32 %v139_v30  ;;  %vm178_vm5 = vweird.f32 %v141_v32 }
  0x30   :  { %280 = vrsqrt.f32 %v140_v31 }
  0x31   :  { %282 = vrsqrt.f32 %v141_v32 }
  0x34   :  { %v277_v33 = vpop.eup %276 }
  0x35   :  { %v279_v34 = vpop.eup %278  ;;  %v143_v35 = vmul.f32 %v277_v33, %v138_v29  ;;  %vm149_vm4 = vweird.f32 %v277_v33 }
  0x36   :  { %v281_v36 = vpop.eup %280  ;;  %v153_v37 = vmul.f32 %v279_v34, %v139_v30  ;;  %vm159_vm2 = vweird.f32 %v279_v34  ;;  %vm413_vm9 = vmor %vm148_vm3, %vm149_vm4 }
  0x37   :  { %v283_v38 = vpop.eup %282  ;;  %v144_v39 = vmul.f32 %v277_v33, %v143_v35  ;;  %v163_v40 = vmul.f32 %v281_v36, %v140_v31  ;;  %vm407_vm7 = vmor %vm158_vm1, %vm159_vm2  ;;  %vm169_vm10 = vweird.f32 %v281_v36 }
  0x38   :  { %v154_v41 = vmul.f32 %v279_v34, %v153_v37  ;;  %v173_v42 = vmul.f32 %v283_v38, %v141_v32  ;;  %vm179_vm6 = vweird.f32 %v283_v38  ;;  %vm170_vm12 = vmor %vm168_vm8, %vm169_vm10 }
  0x39   :  { %v145_v43 = vmul.f32 0.5, %v144_v39  ;;  %v164_v44 = vmul.f32 %v281_v36, %v163_v40  ;;  %vm180_vm11 = vmor %vm178_vm5, %vm179_vm6 }
  0x3a   :  { %v155_v45 = vmul.f32 0.5, %v154_v41  ;;  %v174_v48 = vmul.f32 %v283_v38, %v173_v42 }
  0x3b   :  { %v146_v46 = vsub.f32 1.5, %v145_v43  ;;  %v165_v47 = vmul.f32 0.5, %v164_v44 }
  0x3c   :  { %v156_v49 = vsub.f32 1.5, %v155_v45  ;;  %v175_v56 = vmul.f32 0.5, %v174_v48 }
  0x3d   :  { %v147_v53 = vmul.f32 %v277_v33, %v146_v46  ;;  %v166_v55 = vsub.f32 1.5, %v165_v47 }
  0x3e   :  { %v157_v57 = vmul.f32 %v279_v34, %v156_v49  ;;  %v176_v62 = vsub.f32 1.5, %v175_v56 }
  0x3f   :  { %v167_v61 = vmul.f32 %v281_v36, %v166_v55  ;;  %v151_v59 = vsel %vm413_vm9, %v277_v33, %v147_v53 }
  0x40   :  { %v161_v60 = vsel %vm407_vm7, %v279_v34, %v157_v57  ;;  %v177_v5 = vmul.f32 %v283_v38, %v176_v62 }
  0x41   :  { %v200_v1 = vrot.slane %v161_v60, 4  ;;  %v171_v6 = vsel %vm170_vm12, %v281_v36, %v167_v61 }
  0x42   :  { %v181_v7 = vsel %vm180_vm11, %v283_v38, %v177_v5 }
  0x43   :  { %v202_v9 = vsel %vm46_vm0, %v151_v59, %v200_v1  ;;  %v201_v10 = vrot.slane %v181_v7, 4 }
  0x44   :  { %v206_v11 = vmul.f32 %v202_v9, %v194_v0 }
  0x45   :  { %v203_v12 = vsel %vm46_vm0, %v171_v6, %v201_v10 }
  0x46   :  { %215 = vst [vmem:[#allocation1] ss:$2 sm:$0xff] %v206_v11  ;;  %v207_v13 = vmul.f32 %v203_v12, %v195_v8 }
  0x48   :  { %219 = vst [vmem:[#allocation1 + $0x10] ss:$2 sm:$0xff] %v207_v13 }
  0x4d   :  { %v217_v15 = vld.sshfl [vmem:[#allocation1 + $0x8] sm:$0xff pattern:$0x75316420]  ;;  %v216_v16 = vld.sshfl [vmem:[#allocation1] sm:$0xff pattern:$0x75316420] }
  0x4f   :  { %v221_v2 = vld.sshfl [vmem:[#allocation1 + $0x18] sm:$0xff pattern:$0x75316420]  ;;  %v220_v3 = vld.sshfl [vmem:[#allocation1 + $0x10] sm:$0xff pattern:$0x75316420] }
  0x7a   :  { %v211_v14 = vpop.permute.xlu0 %210 }
  0x7b   :  { %v227_v17 = vmul.f32 %v217_v15, %v211_v14  ;;  %v229_v18 = vmul.f32 %v221_v2, %v211_v14  ;;  %v226_v20 = vmul.f32 %v216_v16, %v211_v14  ;;  %v228_v21 = vmul.f32 %v220_v3, %v211_v14 }
  0x82   :  { %v233_v19 = vpop.permute.xlu0 %232 }
  0x83   :  { %v236_v4 = vadd.f32 %v233_v19, %v227_v17  ;;  %v238_v22 = vadd.f32 %v233_v19, %v229_v18  ;;  %v235_v23 = vadd.f32 %v233_v19, %v226_v20  ;;  %v237_v24 = vadd.f32 %v233_v19, %v228_v21 }
  0x85   :  { %v243_v25 = vrot.slane %v236_v4, 4  ;;  %v244_v26 = vrot.slane %v238_v22, 4 }
  0x87   :  { %v245_v27 = vsel %vm46_vm0, %v235_v23, %v243_v25  ;;  %v246_v28 = vsel %vm46_vm0, %v237_v24, %v244_v26 }
  0x88   :  { %249 = vst [vmem:[#allocation5] sm:$0xff] %v245_v27 }
  0x89   :  { %250 = vst [vmem:[#allocation5 + $0x8] sm:$0xff] %v246_v28 }
  0x8a   :  { %263 = dma.vmem_to_hbm [thread:$0]  %s256_s2, 256, %s258_s24, [#allocation4], %s337_s17, %s337_s17, %s338_s18  }
  0x8b   :  { %334 = dma.done.wait [#allocation4], 256  }
  0x8c   :  { %335 = vsyncadd [#allocation4], 4294967040 }
  0x8d   :  { %268 = vsyncpa [#allocation3], 1 }
  0x8e   :  { %269 = vsyncpa [#allocation4], 1 }

</bundles_post_ra>
